<compile_context>
chip_gen: v6e
topology: v6e:2x2x1
jax: 0.10.0
libtpu: 0.0.40
codegen_flags: <defaults>
</compile_context>

<pallas_src>
import functools
import math

import jax
import jax.numpy as jnp
from jax.experimental import pallas as pl
from jax.experimental.pallas import tpu as pltpu

_LANE = 128


def _round_up(x, m):
    return ((x + m - 1) // m) * m


# ---------------------------------------------------------------------------
# Kernel A: projection.
#   h   = x @ W   (f32 MXU) -> stored bf16, with a ones-column at index `fout`
#                  so the aggregation matmul produces the softmax row-sum free.
#   s_l = h . a[:, :F]   (per destination node, f32, (Np, 1))
#   s_r = h . a[:, F:]   (per source node,      f32, (Np, 1))
# ---------------------------------------------------------------------------
def _proj_kernel(x_ref, w_ref, al_ref, ar_ref, h_ref, sl_ref, sr_ref, *, fout):
    x = x_ref[...]                                            # (TM, Fin) f32
    w = w_ref[...]                                            # (Fin, Fp) f32
    h = jnp.dot(x, w, preferred_element_type=jnp.float32)     # (TM, Fp)  MXU
    # Attention score halves in f32 (VPU multiply + lane reduce).
    sl_ref[...] = jnp.sum(h * al_ref[...], axis=1, keepdims=True)
    sr_ref[...] = jnp.sum(h * ar_ref[...], axis=1, keepdims=True)
    # Ones-column in the (otherwise zero) padding: acc[:, fout] == row-sum.
    col = jax.lax.broadcasted_iota(jnp.int32, h.shape, 1)
    h = jnp.where(col == fout, 1.0, h)
    h_ref[...] = h.astype(h_ref.dtype)                        # bf16


# ---------------------------------------------------------------------------
# Kernel B: flash-style masked softmax aggregation.
#   grid = (row blocks [parallel], col blocks [arbitrary, reduction last])
#   out_i = elu( sum_j softmax_j(leakyrelu(s_l_i + s_r_j) | mask_ij) * h_j )
# ---------------------------------------------------------------------------
def _agg_kernel(hcol_ref, sl_ref, sr_ref, mask_ref, out_ref,
                m_sc, acc_sc, *, alpha, fout, concat):
    j = pl.program_id(1)
    nj = pl.num_programs(1)

    @pl.when(j == 0)
    def _init():
        m_sc[...] = jnp.full(m_sc.shape, -jnp.inf, jnp.float32)
        acc_sc[...] = jnp.zeros(acc_sc.shape, jnp.float32)

    scores = sl_ref[...] + sr_ref[...]                        # (TM, TN) f32
    leaky = jnp.where(scores > 0, scores, alpha * scores)
    leaky = jnp.where(mask_ref[...] > 0, leaky, -jnp.inf)     # edges only

    m_prev = m_sc[...]
    m_new = jnp.maximum(m_prev, jnp.max(leaky, axis=1, keepdims=True))
    m_safe = jnp.where(m_new == -jnp.inf, 0.0, m_new)         # avoid inf-inf
    corr = jnp.exp(m_prev - m_safe)           # 0 until the first edge is seen
    p = jnp.exp(leaky - m_safe)               # 0 on non-edges

    # bf16 operands, f32 accumulation.  The ones-column of h makes
    # acc[:, fout] the running softmax denominator (no separate row-sum).
    acc_sc[...] = corr * acc_sc[...] + jnp.dot(
        p.astype(jnp.bfloat16), hcol_ref[...],
        preferred_element_type=jnp.float32)
    m_sc[...] = m_new

    @pl.when(j == nj - 1)
    def _finalize():
        acc = acc_sc[...]
        inv = pl.reciprocal(acc[:, fout:fout + 1] + 1e-15, approx=True)
        h_prime = acc * inv
        if concat:
            # ELU (alpha=1); exp(x)-1 keeps the lowering to plainly-supported
            # ops (difference from expm1 is ~1e-7, negligible here).
            h_prime = jnp.where(h_prime > 0, h_prime, jnp.exp(h_prime) - 1.0)
        out_ref[...] = h_prime.astype(out_ref.dtype)


# ---------------------------------------------------------------------------
# Wrapper
# ---------------------------------------------------------------------------
def spgat_forward(inputs, W, a, adj_mask, *, alpha, concat=True,
                  tile_m=256, tile_n=256):
    """Pallas SPGAT forward.

    inputs: (N, Fin); W: (Fin, Fout); a: (1, 2*Fout);
    adj_mask: (N, N) {0,1} mask built from the COO edge list.
    """
    inputs = jnp.asarray(inputs, jnp.float32)
    W = jnp.asarray(W, jnp.float32)
    a = jnp.asarray(a, jnp.float32)

    N, Fin = inputs.shape
    Fout = W.shape[1]

    # Lane-dense feature dim with at least one spare (padding) column that
    # hosts the ones-column used for the row-sum-in-matmul trick.
    Fp = _round_up(Fout + 1, _LANE)
    Np = _round_up(N, math.lcm(tile_m, tile_n))
    nri, ncj = Np // tile_m, Np // tile_n

    # ---- pad to TPU-friendly shapes (padding rows/cols carry no edges) ----
    x_p = jnp.zeros((Np, Fin), jnp.float32).at[:N, :].set(inputs)
    W_p = jnp.zeros((Fin, Fp), jnp.float32).at[:, :Fout].set(W)
    a_l = jnp.zeros((1, Fp), jnp.float32).at[:, :Fout].set(a[:, :Fout])
    a_r = jnp.zeros((1, Fp), jnp.float32).at[:, :Fout].set(a[:, Fout:])
    mask_p = jnp.zeros((Np, Np), jnp.int8).at[:N, :N].set(
        (adj_mask > 0).astype(jnp.int8))

    # ---- kernel A: projection + attention score halves --------------------
    h, s_l, s_r = pl.pallas_call(
        functools.partial(_proj_kernel, fout=Fout),
        out_shape=(jax.ShapeDtypeStruct((Np, Fp), jnp.bfloat16),
                   jax.ShapeDtypeStruct((Np, 1), jnp.float32),
                   jax.ShapeDtypeStruct((Np, 1), jnp.float32)),
        grid=(nri,),
        in_specs=[
            pl.BlockSpec((tile_m, Fin), lambda i: (i, 0)),
            pl.BlockSpec((Fin, Fp), lambda i: (0, 0)),
            pl.BlockSpec((1, Fp), lambda i: (0, 0)),
            pl.BlockSpec((1, Fp), lambda i: (0, 0)),
        ],
        out_specs=(
            pl.BlockSpec((tile_m, Fp), lambda i: (i, 0)),
            pl.BlockSpec((tile_m, 1), lambda i: (i, 0)),
            pl.BlockSpec((tile_m, 1), lambda i: (i, 0)),
        ),
        compiler_params=pltpu.CompilerParams(
            dimension_semantics=("parallel",)),
    )(x_p, W_p, a_l, a_r)

    # s_r broadcasts along rows in the aggregation kernel: present it as a
    # lane-dense (1, Np) row (trivial reshape, identical memory order).
    s_r_row = jnp.reshape(s_r, (1, Np))

    # ---- kernel B: flash-style masked softmax aggregation -----------------
    kernel = functools.partial(_agg_kernel, alpha=float(alpha), fout=Fout,
                               concat=bool(concat))
    cost = pl.CostEstimate(
        flops=int(2 * Np * Np * Fp + 10 * Np * Np),
        transcendentals=int(Np * Np),
        bytes_accessed=int(Np * Np + 2 * nri * Np * Fp + 4 * Np * Fp),
    )
    out_p = pl.pallas_call(
        kernel,
        out_shape=jax.ShapeDtypeStruct((Np, Fp), jnp.float32),
        grid_spec=pltpu.PrefetchScalarGridSpec(
            num_scalar_prefetch=0,
            grid=(nri, ncj),
            in_specs=[
                pl.BlockSpec((tile_n, Fp), lambda i, j: (j, 0)),       # h cols (bf16)
                pl.BlockSpec((tile_m, 1), lambda i, j: (i, 0)),        # s_l column
                pl.BlockSpec((1, tile_n), lambda i, j: (0, j)),        # s_r row
                pl.BlockSpec((tile_m, tile_n), lambda i, j: (i, j)),   # mask (int8)
            ],
            out_specs=pl.BlockSpec((tile_m, Fp), lambda i, j: (i, 0)),
            scratch_shapes=[
                pltpu.VMEM((tile_m, 1), jnp.float32),    # running max
                pltpu.VMEM((tile_m, Fp), jnp.float32),   # accumulator (+row-sum col)
            ],
        ),
        compiler_params=pltpu.CompilerParams(
            dimension_semantics=("parallel", "arbitrary")),
        cost_estimate=cost,
    )(h, s_l, s_r_row, mask_p)

    return out_p[:N, :Fout]


def spgat_reference(inputs, W, a, adj_mask, *, alpha, concat=True):
    """Pure-JAX reference mirroring the PyTorch forward (global edge max)."""
    h = inputs @ W
    fout = W.shape[1]
    s_l = h @ a[:, :fout].T
    s_r = h @ a[:, fout:].T
    scores = s_l + s_r.T
    leaky = jnp.where(scores > 0, scores, alpha * scores)
    mask = adj_mask > 0
    edge_max = jnp.max(jnp.where(mask, leaky, -jnp.inf))
    e_value = jnp.where(mask, jnp.exp(leaky - edge_max), 0.0)
    e_rowsum = jnp.sum(e_value, axis=1, keepdims=True)
    h_prime = (e_value @ h) / (e_rowsum + 1e-15)
    if concat:
        h_prime = jnp.where(h_prime > 0, h_prime, jnp.expm1(h_prime))
    return h_prime


if __name__ == "__main__":
    root = jax.random.PRNGKey(0)
    Fin, Fout = 16, 32
    alpha = 0.2          # LeakyReLU negative slope
    concat = True

    # N=200: exercises padding (single-block grid);
    # N=600: exercises the multi-block online-softmax streaming path.
    for idx, N in enumerate((200, 600)):
        key = jax.random.fold_in(root, idx)
        k_x, k_w, k_a, k_e = jax.random.split(key, 4)

        inputs = jax.random.normal(k_x, (N, Fin), dtype=jnp.float32)
        w_std = 1.414 * (2.0 / (Fin + Fout)) ** 0.5
        W = w_std * jax.random.normal(k_w, (Fin, Fout), dtype=jnp.float32)
        a_std = 1.414 * (2.0 / (1 + 2 * Fout)) ** 0.5
        a = a_std * jax.random.normal(k_a, (1, 2 * Fout), dtype=jnp.float32)

        # Deterministic sparse adjacency (~10% density) + self loops.
        adj_mask = (jax.random.uniform(k_e, (N, N)) < 0.1).astype(jnp.float32)
        adj_mask = jnp.maximum(adj_mask, jnp.eye(N, dtype=jnp.float32))

        out = spgat_forward(inputs, W, a, adj_mask, alpha=alpha, concat=concat)
        out = jax.block_until_ready(out)

        ref = spgat_reference(inputs, W, a, adj_mask, alpha=alpha, concat=concat)
        assert out.shape == (N, Fout)
        max_err = float(jnp.max(jnp.abs(out - ref)))
        # bf16 h / p on the aggregation path => looser tolerance vs f32 ref.
        assert jnp.allclose(out, ref, rtol=2e-2, atol=2e-2), (
            f"N={N}: mismatch vs reference, max abs err = {max_err}")

    print("KERNEL_OK")
</pallas_src>

<mosaic_0001>
module attributes {stable_mosaic.version = 11 : i64} {
  func.func @_proj_kernel(%arg0: i32, %arg1: memref<256x16xf32, #tpu.memory_space<vmem>>, %arg2: memref<16x128xf32, #tpu.memory_space<vmem>>, %arg3: memref<1x128xf32, #tpu.memory_space<vmem>>, %arg4: memref<1x128xf32, #tpu.memory_space<vmem>>, %arg5: memref<256x128xbf16, #tpu.memory_space<vmem>>, %arg6: memref<256x1xf32, #tpu.memory_space<vmem>>, %arg7: memref<256x1xf32, #tpu.memory_space<vmem>>) attributes {dimension_semantics = [#tpu.dimension_semantics<parallel>], iteration_bounds = array<i64: 1>, scalar_prefetch = 0 : i64, scratch_operands = 0 : i64, tpu.core_type = #tpu.core_type<tc>, window_params = [{transform_indices = @transform_0, window_bounds = array<i64: 256, 16>}, {pipeline_mode = #tpu.pipeline_mode<synchronous>, transform_indices = @transform_1, window_bounds = array<i64: 16, 128>}, {pipeline_mode = #tpu.pipeline_mode<synchronous>, transform_indices = @transform_2, window_bounds = array<i64: 1, 128>}, {pipeline_mode = #tpu.pipeline_mode<synchronous>, transform_indices = @transform_3, window_bounds = array<i64: 1, 128>}, {transform_indices = @transform_4, window_bounds = array<i64: 256, 128>}, {transform_indices = @transform_5, window_bounds = array<i64: 256, 1>}, {transform_indices = @transform_6, window_bounds = array<i64: 256, 1>}]} {
    %c0 = arith.constant 0 : index
    %c0_0 = arith.constant 0 : index
    %0 = vector.load %arg1[%c0, %c0_0] : memref<256x16xf32, #tpu.memory_space<vmem>>, vector<256x16xf32>
    %c0_1 = arith.constant 0 : index
    %c0_2 = arith.constant 0 : index
    %1 = vector.load %arg2[%c0_1, %c0_2] : memref<16x128xf32, #tpu.memory_space<vmem>>, vector<16x128xf32>
    %cst = arith.constant dense<0.000000e+00> : vector<256x128xf32>
    %2 = tpu.matmul %0, %1, %cst {dimension_numbers = #tpu.dot_dimension_numbers<[1], [0], [0], [1], [0, 0, 1, 1], [], []>} : vector<256x16xf32>, vector<16x128xf32>, vector<256x128xf32> -> vector<256x128xf32>
    %c0_3 = arith.constant 0 : index
    %c0_4 = arith.constant 0 : index
    %3 = vector.load %arg3[%c0_3, %c0_4] : memref<1x128xf32, #tpu.memory_space<vmem>>, vector<1x128xf32>
    %4 = vector.broadcast %3 : vector<1x128xf32> to vector<256x128xf32>
    %5 = arith.mulf %2, %4 : vector<256x128xf32>
    %cst_5 = arith.constant dense<0.000000e+00> : vector<256xf32>
    %6 = vector.multi_reduction <add>, %5, %cst_5 [1] : vector<256x128xf32> to vector<256xf32>
    %7 = vector.shape_cast %6 : vector<256xf32> to vector<256x1xf32>
    %c0_6 = arith.constant 0 : index
    %c0_7 = arith.constant 0 : index
    %8 = vector.load %arg6[%c0_6, %c0_7] : memref<256x1xf32, #tpu.memory_space<vmem>>, vector<256x1xf32>
    tpu.vector_store %arg6[%c0_6, %c0_7], %7 {strides = array<i32>} : memref<256x1xf32, #tpu.memory_space<vmem>>, vector<256x1xf32>,
    %c0_8 = arith.constant 0 : index
    %c0_9 = arith.constant 0 : index
    %9 = vector.load %arg4[%c0_8, %c0_9] : memref<1x128xf32, #tpu.memory_space<vmem>>, vector<1x128xf32>
    %10 = vector.broadcast %9 : vector<1x128xf32> to vector<256x128xf32>
    %11 = arith.mulf %2, %10 : vector<256x128xf32>
    %cst_10 = arith.constant dense<0.000000e+00> : vector<256xf32>
    %12 = vector.multi_reduction <add>, %11, %cst_10 [1] : vector<256x128xf32> to vector<256xf32>
    %13 = vector.shape_cast %12 : vector<256xf32> to vector<256x1xf32>
    %c0_11 = arith.constant 0 : index
    %c0_12 = arith.constant 0 : index
    %14 = vector.load %arg7[%c0_11, %c0_12] : memref<256x1xf32, #tpu.memory_space<vmem>>, vector<256x1xf32>
    tpu.vector_store %arg7[%c0_11, %c0_12], %13 {strides = array<i32>} : memref<256x1xf32, #tpu.memory_space<vmem>>, vector<256x1xf32>,
    %15 = tpu.iota {dimensions = array<i32: 1>} : vector<256x128xi32>
    %c32_i32 = arith.constant 32 : i32
    %16 = vector.broadcast %c32_i32 : i32 to vector<256x128xi32>
    %17 = arith.cmpi eq, %15, %16 : vector<256x128xi32>
    %cst_13 = arith.constant 1.000000e+00 : f32
    %18 = vector.broadcast %cst_13 : f32 to vector<256x128xf32>
    %19 = arith.select %17, %18, %2 : vector<256x128xi1>, vector<256x128xf32>
    %20 = arith.truncf %19 : vector<256x128xf32> to vector<256x128xbf16>
    %c0_14 = arith.constant 0 : index
    %c0_15 = arith.constant 0 : index
    %21 = vector.load %arg5[%c0_14, %c0_15] : memref<256x128xbf16, #tpu.memory_space<vmem>>, vector<256x128xbf16>
    tpu.vector_store %arg5[%c0_14, %c0_15], %20 {strides = array<i32>} : memref<256x128xbf16, #tpu.memory_space<vmem>>, vector<256x128xbf16>,
    return
  }
  func.func @transform_0(%arg0: i32) -> (i32, i32) {
    %c0_i32 = arith.constant 0 : i32
    %c0_i32_0 = arith.constant 0 : i32
    return %arg0, %c0_i32 : i32, i32
  }
  func.func @transform_1(%arg0: i32) -> (i32, i32) {
    %c0_i32 = arith.constant 0 : i32
    %c0_i32_0 = arith.constant 0 : i32
    %c0_i32_1 = arith.constant 0 : i32
    return %c0_i32, %c0_i32_0 : i32, i32
  }
  func.func @transform_2(%arg0: i32) -> (i32, i32) {
    %c0_i32 = arith.constant 0 : i32
    %c0_i32_0 = arith.constant 0 : i32
    %c0_i32_1 = arith.constant 0 : i32
    return %c0_i32, %c0_i32_0 : i32, i32
  }
  func.func @transform_3(%arg0: i32) -> (i32, i32) {
    %c0_i32 = arith.constant 0 : i32
    %c0_i32_0 = arith.constant 0 : i32
    %c0_i32_1 = arith.constant 0 : i32
    return %c0_i32, %c0_i32_0 : i32, i32
  }
  func.func @transform_4(%arg0: i32) -> (i32, i32) {
    %c0_i32 = arith.constant 0 : i32
    %c0_i32_0 = arith.constant 0 : i32
    return %arg0, %c0_i32 : i32, i32
  }
  func.func @transform_5(%arg0: i32) -> (i32, i32) {
    %c0_i32 = arith.constant 0 : i32
    %c0_i32_0 = arith.constant 0 : i32
    return %arg0, %c0_i32 : i32, i32
  }
  func.func @transform_6(%arg0: i32) -> (i32, i32) {
    %c0_i32 = arith.constant 0 : i32
    %c0_i32_0 = arith.constant 0 : i32
    return %arg0, %c0_i32 : i32, i32
  }
}

</mosaic_0001>

<bundles_post_ra>
// kernel: tpu_custom_call.1
= control target key start
LH: loop header
LB: loop body
LE: loop exit
PB: predicated region body
PF: predicated region fallthrough
CT: control target
= control target key end

     0   :  { %vm55_vm0 = vcmask 130048   ;;  %s1900_s0 = inlined_call_operand.vmem [shape: f32[256,16], index: 0, kind: input, shape index: {}]   ;;  %s1901_s1 = inlined_call_operand.vmem [shape: f32[16,128], index: 1, kind: input, shape index: {}]   ;;  %s1902_s2 = inlined_call_operand.vmem [shape: f32[1,128], index: 2, kind: input, shape index: {}]   ;;  %s1903_s3 = inlined_call_operand.vmem [shape: f32[1,128], index: 3, kind: input, shape index: {}]   ;;  %s1904_s4 = inlined_call_operand.hbm [shape: bf16[256,128], index: 4, kind: output, shape index: {0}]   ;;  %s1905_s5 = inlined_call_operand.vmem [shape: f32[256,1], index: 5, kind: output, shape index: {1}]   ;;  %s1906_s6 = inlined_call_operand.vmem [shape: f32[256,1], index: 6, kind: output, shape index: {2}]  }
   0x1   :  { %v54_v0 = vld [vmem:[%s1901_s1 + $0x8] sm:$0xff]  ;;  %v53_v1 = vld [vmem:[%s1901_s1] sm:$0xff]  ;;  %v23_v6 = vld [vmem:[%s1900_s0 + $0x10] sm:$0xff] }
   0x2   :  { %1094 = vmatprep.subr.mxu0 %v54_v0  ;;  %1146 = vmatprep.subr.mxu1 %v54_v0  ;;  %v21_v2 = vld [vmem:[%s1900_s0] sm:$0xff]  ;;  %v22_v4 = vld [vmem:[%s1900_s0 + $0x8] sm:$0xff]  ;;  %v39_v7 = vld [vmem:[%s1900_s0 + $0x90] sm:$0xff] }
   0x3   :  { %1095 = vmatpush3.msra.mxu0 %v54_v0  ;;  %1148 = vmatpush3.msra.mxu1 %v54_v0  ;;  %v37_v3 = vld [vmem:[%s1900_s0 + $0x80] sm:$0xff]  ;;  %v38_v5 = vld [vmem:[%s1900_s0 + $0x88] sm:$0xff]  ;;  %v24_v8 = vld [vmem:[%s1900_s0 + $0x18] sm:$0xff] }
   0x4   :  { %1096 = vmatprep.subr.mxu0 %v53_v1  ;;  %1147 = vmatprep.subr.mxu1 %v53_v1  ;;  %v40_v9 = vld [vmem:[%s1900_s0 + $0x98] sm:$0xff]  ;;  %v25_v10 = vld [vmem:[%s1900_s0 + $0x20] sm:$0xff]  ;;  %v26_v12 = vld [vmem:[%s1900_s0 + $0x28] sm:$0xff] }
   0x5   :  { %1097 = vmatpush3.msra.mxu0 %v53_v1  ;;  %1149 = vmatpush3.msra.mxu1 %v53_v1  ;;  %v41_v11 = vld [vmem:[%s1900_s0 + $0xa0] sm:$0xff]  ;;  %v42_v13 = vld [vmem:[%s1900_s0 + $0xa8] sm:$0xff] }
   0x6   :  { %1098 = vmatprep.mubr.msk.f32.mxu0 %vm55_vm0, %v21_v2  ;;  %1122 = vmatprep.mubr.msk.f32.mxu1 %vm55_vm0, %v37_v3 }
   0x7   :  { %1099 = vmatmul.mubr.msk.f32.vlgmr.msra.gmra.mxu0 %vm55_vm0, %v22_v4  ;;  %1123 = vmatmul.mubr.msk.f32.vlgmr.msra.gmra.mxu1 %vm55_vm0, %v38_v5 }
   0x8   :  { %1101 = vmatprep.mubr.msk.f32.mxu0 %vm55_vm0, %v23_v6  ;;  %1125 = vmatprep.mubr.msk.f32.mxu1 %vm55_vm0, %v39_v7 }
   0xb   :  { %1102 = vmatmul.mubr.msk.f32.gmra.mxu0 %vm55_vm0, %v24_v8  ;;  %1126 = vmatmul.mubr.msk.f32.gmra.mxu1 %vm55_vm0, %v40_v9 }
   0xc   :  { %1104 = vmatprep.mubr.msk.f32.mxu0 %vm55_vm0, %v25_v10  ;;  %1128 = vmatprep.mubr.msk.f32.mxu1 %vm55_vm0, %v41_v11 }
   0xd   :  { %12 = vsyncpa [#allocation3], 0  ;;  %v27_v14 = vld [vmem:[%s1900_s0 + $0x30] sm:$0xff]  ;;  %v28_v16 = vld [vmem:[%s1900_s0 + $0x38] sm:$0xff]  ;;  %v648_v34 = vlaneseq  ;;  %vm480_vm2 = vcmask 7168  }
   0xe   :  { %v43_v15 = vld [vmem:[%s1900_s0 + $0xb0] sm:$0xff]  ;;  %v44_v17 = vld [vmem:[%s1900_s0 + $0xb8] sm:$0xff]  ;;  %v29_v18 = vld [vmem:[%s1900_s0 + $0x40] sm:$0xff] }
   0xf   :  { %1105 = vmatmul.mubr.msk.f32.gmra.mxu0 %vm55_vm0, %v26_v12  ;;  %1129 = vmatmul.mubr.msk.f32.gmra.mxu1 %vm55_vm0, %v42_v13  ;;  %v45_v19 = vld [vmem:[%s1900_s0 + $0xc0] sm:$0xff]  ;;  %v30_v20 = vld [vmem:[%s1900_s0 + $0x48] sm:$0xff]  ;;  %v31_v22 = vld [vmem:[%s1900_s0 + $0x50] sm:$0xff]  ;;  %v1347_v35 = vand.u32 127, %v648_v34 }
  0x10   :  { %1107 = vmatprep.mubr.msk.f32.mxu0 %vm55_vm0, %v27_v14  ;;  %1131 = vmatprep.mubr.msk.f32.mxu1 %vm55_vm0, %v43_v15  ;;  %v46_v21 = vld [vmem:[%s1900_s0 + $0xc8] sm:$0xff]  ;;  %v47_v23 = vld [vmem:[%s1900_s0 + $0xd0] sm:$0xff]  ;;  %v32_v24 = vld [vmem:[%s1900_s0 + $0x58] sm:$0xff] }
  0x11   :  { %v48_v25 = vld [vmem:[%s1900_s0 + $0xd8] sm:$0xff]  ;;  %v33_v26 = vld [vmem:[%s1900_s0 + $0x60] sm:$0xff]  ;;  %v34_v28 = vld [vmem:[%s1900_s0 + $0x68] sm:$0xff]  ;;  %vm650_vm1 = vcmp.eq.s32.totalorder %v1347_v35, 32 }
  0x12   :  { %v49_v27 = vld [vmem:[%s1900_s0 + $0xe0] sm:$0xff]  ;;  %v50_v29 = vld [vmem:[%s1900_s0 + $0xe8] sm:$0xff]  ;;  %v35_v30 = vld [vmem:[%s1900_s0 + $0x70] sm:$0xff] }
  0x13   :  { %1108 = vmatmul.mubr.msk.f32.gmra.mxu0 %vm55_vm0, %v28_v16  ;;  %1132 = vmatmul.mubr.msk.f32.gmra.mxu1 %vm55_vm0, %v44_v17  ;;  %v51_v31 = vld [vmem:[%s1900_s0 + $0xf0] sm:$0xff]  ;;  %v36_v32 = vld [vmem:[%s1900_s0 + $0x78] sm:$0xff]  ;;  %v1352_v36 = vld [vmem:[%s1902_s2] ss:$0 sm:$0xff]  ;;  %s1175_s2 = smov [#allocation2]  }
  0x14   :  { %1110 = vmatprep.mubr.msk.f32.mxu0 %vm55_vm0, %v29_v18  ;;  %1134 = vmatprep.mubr.msk.f32.mxu1 %vm55_vm0, %v45_v19  ;;  %v52_v33 = vld [vmem:[%s1900_s0 + $0xf8] sm:$0xff]  ;;  %v1360_v43 = vld [vmem:[%s1903_s3] ss:$0 sm:$0xff]  ;;  %s848_s3 = sshll.u32 %s1175_s2, 4  ;;  %s849_s3 = int_to_ptr.vmem [resolvable:$true] %s848_s3 }
  0x15   :  { %s1153_s17 = scalar_lea.vmem %s849_s3, 2048  ;;  %p1158_p1 = scmp.lt.s32.totalorder %s849_s3, %s849_s3 }
  0x16   :  { %p1154_p0 = scmp.ne.s32.totalorder %s849_s3, %s1153_s17  ;;  %p1159_p2 = scmp.lt.s32.totalorder %s1153_s17, %s1153_s17 }
  0x17   :  { %1111 = vmatmul.mubr.msk.f32.gmra.mxu0 %vm55_vm0, %v30_v20  ;;  %1135 = vmatmul.mubr.msk.f32.gmra.mxu1 %vm55_vm0, %v46_v21 }
  0x18   :  { %1113 = vmatprep.mubr.msk.f32.mxu0 %vm55_vm0, %v31_v22  ;;  %1137 = vmatprep.mubr.msk.f32.mxu1 %vm55_vm0, %v47_v23  ;;  %p1160_p3 = por %p1159_p2, %p1158_p1 }
  0x1a   :  { %p1161_p4 = pnand %p1160_p3, %p1154_p0 }
  0x1b   :  { %1114 = vmatmul.mubr.msk.f32.gmra.mxu0 %vm55_vm0, %v32_v24  ;;  %1138 = vmatmul.mubr.msk.f32.gmra.mxu1 %vm55_vm0, %v48_v25 }
  0x1c   :  { %1116 = vmatprep.mubr.msk.f32.mxu0 %vm55_vm0, %v33_v26  ;;  %1140 = vmatprep.mubr.msk.f32.mxu1 %vm55_vm0, %v49_v27 }
  0x1f   :  { %1117 = vmatmul.mubr.msk.f32.gmra.mxu0 %vm55_vm0, %v34_v28  ;;  %1141 = vmatmul.mubr.msk.f32.gmra.mxu1 %vm55_vm0, %v50_v29 }
  0x20   :  { %1119 = vmatprep.mubr.msk.f32.mxu0 %vm55_vm0, %v35_v30  ;;  %1143 = vmatprep.mubr.msk.f32.mxu1 %vm55_vm0, %v51_v31 }
  0x23   :  { %1120 = vmatmul.mubr.msk.f32.gmra.mxu0 %vm55_vm0, %v36_v32  ;;  %1144 = vmatmul.mubr.msk.f32.gmra.mxu1 %vm55_vm0, %v52_v33 }
  0xc7   :  { %v1100_v37 = vpop.f32.mrf.mxu0  ;;  %v1124_v38 = vpop.f32.mrf.mxu1 }
  0xc8   :  { %v401_v39 = vmul.f32 %v1124_v38, %v1352_v36  ;;  %v385_v40 = vmul.f32 %v1100_v37, %v1352_v36  ;;  %v652_v44 = vsel %vm650_vm1, 1.0, %v1100_v37  ;;  %v668_v45 = vsel %vm650_vm1, 1.0, %v1124_v38 }
  0xc9   :  { %v218_v41 = vpop.f32.mrf.mxu0  ;;  %v298_v42 = vpop.f32.mrf.mxu1  ;;  %v521_v52 = vmul.f32 %v1100_v37, %v1360_v43  ;;  %v537_v0 = vmul.f32 %v1124_v38, %v1360_v43 }
  0xca   :  { %v651_v46 = vsel %vm650_vm1, 1.0, %v218_v41  ;;  %v667_v47 = vsel %vm650_vm1, 1.0, %v298_v42  ;;  %450 = vadd.xlane.f32.xlu1 %v401_v39  ;;  %418 = vadd.xlane.f32.xlu0 %v385_v40  ;;  %v384_v53 = vmul.f32 %v1352_v36, %v218_v41  ;;  %v400_v1 = vmul.f32 %v1352_v36, %v298_v42 }
  0xcb   :  { %v968_v48 = vpack.c.bf16 %v652_v44, %v651_v46  ;;  %v1008_v49 = vpack.c.bf16 %v668_v45, %v667_v47  ;;  %v1103_v50 = vpop.f32.mrf.mxu0  ;;  %v1370_v51 = vpop.f32.mrf.mxu1  ;;  %v520_v13 = vmul.f32 %v1360_v43, %v218_v41  ;;  %v536_v25 = vmul.f32 %v1360_v43, %v298_v42 }
  0xcc   :  { %v654_v54 = vsel %vm650_vm1, 1.0, %v1103_v50  ;;  %v670_v55 = vsel %vm650_vm1, 1.0, %v1370_v51  ;;  %v387_v6 = vmul.f32 %v1103_v50, %v1352_v36  ;;  %v403_v18 = vmul.f32 %v1370_v51, %v1352_v36 }
  0xcd   :  { %969 = vst [vmem:[#allocation2] sm:$0xff] %v968_v48   ;;  %1052 = vst [vmem:[#allocation2 + $0x40] sm:$0xff] %v1008_v49   ;;  %v1379_v56 = vpop.f32.mrf.mxu0  ;;  %v1381_v57 = vpop.f32.mrf.mxu1  ;;  %v523_v32 = vmul.f32 %v1103_v50, %v1360_v43  ;;  %v539_v48 = vmul.f32 %v1370_v51, %v1360_v43 }
  0xce   :  { %554 = vadd.xlane.f32.xlu1 %v521_v52  ;;  %416 = vadd.xlane.f32.xlu0 %v384_v53  ;;  %v653_v58 = vsel %vm650_vm1, 1.0, %v1379_v56  ;;  %v669_v59 = vsel %vm650_vm1, 1.0, %v1381_v57  ;;  %v402_v39 = vmul.f32 %v1352_v36, %v1381_v57  ;;  %v522_v49 = vmul.f32 %v1360_v43, %v1379_v56 }
  0xcf   :  { %v973_v60 = vpack.c.bf16 %v654_v54, %v653_v58  ;;  %v1013_v61 = vpack.c.bf16 %v670_v55, %v669_v59  ;;  %v1389_v62 = vpop.f32.mrf.mxu0  ;;  %v1391_v63 = vpop.f32.mrf.mxu1 }
  0xd0   :  { %v656_v2 = vsel %vm650_vm1, 1.0, %v1389_v62  ;;  %v672_v3 = vsel %vm650_vm1, 1.0, %v1391_v63 }
  0xd1   :  { %1045 = vst [vmem:[#allocation2 + $0x8] sm:$0xff] %v973_v60   ;;  %1053 = vst [vmem:[#allocation2 + $0x48] sm:$0xff] %v1013_v61   ;;  %v1401_v4 = vpop.f32.mrf.mxu0  ;;  %v1403_v5 = vpop.f32.mrf.mxu1 }
  0xd2   :  { %586 = vadd.xlane.f32.xlu1 %v537_v0  ;;  %448 = vadd.xlane.f32.xlu0 %v400_v1  ;;  %v655_v7 = vsel %vm650_vm1, 1.0, %v1401_v4  ;;  %v671_v8 = vsel %vm650_vm1, 1.0, %v1403_v5  ;;  %v388_v35 = vmul.f32 %v1352_v36, %v1401_v4 }
  0xd3   :  { %v978_v9 = vpack.c.bf16 %v656_v2, %v655_v7  ;;  %v1018_v10 = vpack.c.bf16 %v672_v3, %v671_v8  ;;  %v1412_v11 = vpop.f32.mrf.mxu0  ;;  %v1414_v12 = vpop.f32.mrf.mxu1  ;;  %v538_v2 = vmul.f32 %v1360_v43, %v1381_v57  ;;  %v386_v3 = vmul.f32 %v1352_v36, %v1379_v56 }
  0xd4   :  { %v658_v14 = vsel %vm650_vm1, 1.0, %v1412_v11  ;;  %v674_v15 = vsel %vm650_vm1, 1.0, %v1414_v12 }
  0xd5   :  { %1046 = vst [vmem:[#allocation2 + $0x10] sm:$0xff] %v978_v9   ;;  %1054 = vst [vmem:[#allocation2 + $0x50] sm:$0xff] %v1018_v10   ;;  %v1423_v16 = vpop.f32.mrf.mxu0  ;;  %v1425_v17 = vpop.f32.mrf.mxu1 }
  0xd6   :  { %552 = vadd.xlane.f32.xlu0 %v520_v13  ;;  %422 = vadd.xlane.f32.xlu1 %v387_v6  ;;  %v657_v19 = vsel %vm650_vm1, 1.0, %v1423_v16  ;;  %v673_v20 = vsel %vm650_vm1, 1.0, %v1425_v17 }
  0xd7   :  { %v983_v21 = vpack.c.bf16 %v658_v14, %v657_v19  ;;  %v1023_v22 = vpack.c.bf16 %v674_v15, %v673_v20  ;;  %v1435_v23 = vpop.f32.mrf.mxu0  ;;  %v1437_v24 = vpop.f32.mrf.mxu1 }
  0xd8   :  { %v660_v26 = vsel %vm650_vm1, 1.0, %v1435_v23  ;;  %v676_v27 = vsel %vm650_vm1, 1.0, %v1437_v24 }
  0xd9   :  { %1047 = vst [vmem:[#allocation2 + $0x18] sm:$0xff] %v983_v21   ;;  %1055 = vst [vmem:[#allocation2 + $0x58] sm:$0xff] %v1023_v22   ;;  %v1446_v28 = vpop.f32.mrf.mxu0  ;;  %v1448_v29 = vpop.f32.mrf.mxu1 }
  0xda   :  { %584 = vadd.xlane.f32.xlu0 %v536_v25  ;;  %454 = vadd.xlane.f32.xlu1 %v403_v18  ;;  %v659_v30 = vsel %vm650_vm1, 1.0, %v1446_v28  ;;  %v675_v31 = vsel %vm650_vm1, 1.0, %v1448_v29 }
  0xdb   :  { %v988_v33 = vpack.c.bf16 %v660_v26, %v659_v30  ;;  %v1028_v34 = vpack.c.bf16 %v676_v27, %v675_v31  ;;  %v1457_v37 = vpop.f32.mrf.mxu0  ;;  %v1139_v38 = vpop.f32.mrf.mxu1 }
  0xdc   :  { %v662_v40 = vsel %vm650_vm1, 1.0, %v1457_v37  ;;  %v678_v41 = vsel %vm650_vm1, 1.0, %v1139_v38  ;;  %v1467_v42 = vmul.f32 %v1139_v38, %v1352_v36  ;;  %v1475_v46 = vmul.f32 %v1457_v37, %v1360_v43 }
  0xdd   :  { %1048 = vst [vmem:[#allocation2 + $0x20] sm:$0xff] %v988_v33   ;;  %1056 = vst [vmem:[#allocation2 + $0x60] sm:$0xff] %v1028_v34   ;;  %v1469_v44 = vpop.f32.mrf.mxu0  ;;  %v1471_v45 = vpop.f32.mrf.mxu1  ;;  %v1478_v47 = vmul.f32 %v1139_v38, %v1360_v43 }
  0xde   :  { %452 = vadd.xlane.f32.xlu0 %v402_v39  ;;  %558 = vadd.xlane.f32.xlu1 %v523_v32  ;;  %v661_v50 = vsel %vm650_vm1, 1.0, %v1469_v44  ;;  %v677_v52 = vsel %vm650_vm1, 1.0, %v1471_v45  ;;  %v1492_v55 = vmul.f32 %v1360_v43, %v1469_v44  ;;  %v1496_v51 = vmul.f32 %v1360_v43, %v1471_v45 }
  0xdf   :  { %v993_v53 = vpack.c.bf16 %v662_v40, %v661_v50  ;;  %v1033_v54 = vpack.c.bf16 %v678_v41, %v677_v52  ;;  %v1118_v58 = vpop.f32.mrf.mxu0  ;;  %v1142_v59 = vpop.f32.mrf.mxu1  ;;  %v389_v52 = vmul.f32 %v1389_v62, %v1352_v36 }
  0xe0   :  { %v664_v60 = vsel %vm650_vm1, 1.0, %v1118_v58  ;;  %v680_v61 = vsel %vm650_vm1, 1.0, %v1142_v59  ;;  %v1503_v0 = vmul.f32 %v1118_v58, %v1352_v36  ;;  %v1506_v1 = vmul.f32 %v1142_v59, %v1352_v36 }
  0xe1   :  { %1049 = vst [vmem:[#allocation2 + $0x28] sm:$0xff] %v993_v53   ;;  %1057 = vst [vmem:[#allocation2 + $0x68] sm:$0xff] %v1033_v54   ;;  %v278_v6 = vpop.f32.mrf.mxu0  ;;  %v358_v7 = vpop.f32.mrf.mxu1  ;;  %v1513_v8 = vmul.f32 %v1118_v58, %v1360_v43  ;;  %v1516_v9 = vmul.f32 %v1142_v59, %v1360_v43  ;;  %v405_v53 = vmul.f32 %v1391_v63, %v1352_v36 }
  0xe2   :  { %590 = vadd.xlane.f32.xlu1 %v539_v48  ;;  %556 = vadd.xlane.f32.xlu0 %v522_v49  ;;  %v663_v10 = vsel %vm650_vm1, 1.0, %v278_v6  ;;  %v679_v57 = vsel %vm650_vm1, 1.0, %v358_v7  ;;  %v1523_v56 = vmul.f32 %v1352_v36, %v278_v6  ;;  %v1526_v13 = vmul.f32 %v1352_v36, %v358_v7 }
  0xe3   :  { %v998_v14 = vpack.c.bf16 %v664_v60, %v663_v10  ;;  %v1038_v15 = vpack.c.bf16 %v680_v61, %v679_v57  ;;  %v1529_v18 = vmul.f32 %v1360_v43, %v278_v6  ;;  %v1121_v19 = vpop.f32.mrf.mxu0  ;;  %v1532_v20 = vmul.f32 %v1360_v43, %v358_v7  ;;  %v1145_v21 = vpop.f32.mrf.mxu1 }
  0xe4   :  { %v666_v22 = vsel %vm650_vm1, 1.0, %v1121_v19  ;;  %v682_v25 = vsel %vm650_vm1, 1.0, %v1145_v21  ;;  %v1539_v26 = vmul.f32 %v1121_v19, %v1352_v36  ;;  %v1542_v27 = vmul.f32 %v1145_v21, %v1352_v36 }
  0xe5   :  { %1050 = vst [vmem:[#allocation2 + $0x30] sm:$0xff] %v998_v14   ;;  %1058 = vst [vmem:[#allocation2 + $0x70] sm:$0xff] %v1038_v15   ;;  %v288_v30 = vpop.f32.mrf.mxu0  ;;  %v368_v31 = vpop.f32.mrf.mxu1  ;;  %v1545_v32 = vmul.f32 %v1121_v19, %v1360_v43  ;;  %v1548_v33 = vmul.f32 %v1145_v21, %v1360_v43  ;;  %v404_v54 = vmul.f32 %v1352_v36, %v1403_v5 }
  0xe6   :  { %588 = vadd.xlane.f32.xlu0 %v538_v2  ;;  %420 = vadd.xlane.f32.xlu1 %v386_v3  ;;  %v665_v34 = vsel %vm650_vm1, 1.0, %v288_v30  ;;  %v681_v38 = vsel %vm650_vm1, 1.0, %v368_v31  ;;  %v1555_v39 = vmul.f32 %v1352_v36, %v288_v30  ;;  %v1558_v40 = vmul.f32 %v1352_v36, %v368_v31 }
  0xe7   :  { %v1003_v41 = vpack.c.bf16 %v666_v22, %v665_v34  ;;  %v1043_v48 = vpack.c.bf16 %v682_v25, %v681_v38  ;;  %v1561_v49 = vmul.f32 %v1360_v43, %v288_v30  ;;  %v1564_v50 = vmul.f32 %v1360_v43, %v368_v31 }
  0xe8   :  { %v525_v58 = vmul.f32 %v1389_v62, %v1360_v43  ;;  %v524_v59 = vmul.f32 %v1360_v43, %v1401_v4  ;;  %v541_v60 = vmul.f32 %v1391_v63, %v1360_v43  ;;  %v540_v61 = vmul.f32 %v1360_v43, %v1403_v5 }
  0xe9   :  { %1051 = vst [vmem:[#allocation2 + $0x38] sm:$0xff] %v1003_v41   ;;  %1059 = vst [vmem:[#allocation2 + $0x78] sm:$0xff] %v1043_v48   ;;  %v391_v2 = vmul.f32 %v1412_v11, %v1352_v36  ;;  %v390_v3 = vmul.f32 %v1352_v36, %v1423_v16  ;;  %v407_v62 = vmul.f32 %v1414_v12, %v1352_v36 }
  0xea   :  { %426 = vadd.xlane.f32.xlu1 %v389_v52  ;;  %424 = vadd.xlane.f32.xlu0 %v388_v35  ;;  %v406_v4 = vmul.f32 %v1352_v36, %v1425_v17  ;;  %v527_v63 = vmul.f32 %v1412_v11, %v1360_v43  ;;  %v526_v5 = vmul.f32 %v1360_v43, %v1423_v16 }
  0xeb   :  { %v543_v6 = vmul.f32 %v1414_v12, %v1360_v43  ;;  %v542_v7 = vmul.f32 %v1360_v43, %v1425_v17  ;;  %v393_v10 = vmul.f32 %v1435_v23, %v1352_v36  ;;  %v392_v57 = vmul.f32 %v1352_v36, %v1446_v28 }
  0xec   :  { %v409_v11 = vmul.f32 %v1437_v24, %v1352_v36  ;;  %v408_v16 = vmul.f32 %v1352_v36, %v1448_v29  ;;  %v529_v12 = vmul.f32 %v1435_v23, %v1360_v43  ;;  %v528_v17 = vmul.f32 %v1360_v43, %v1446_v28 }
  0xed   :  { %v545_v14 = vmul.f32 %v1437_v24, %v1360_v43  ;;  %v544_v15 = vmul.f32 %v1360_v43, %v1448_v29  ;;  %v395_v19 = vmul.f32 %v1457_v37, %v1352_v36  ;;  %v394_v21 = vmul.f32 %v1352_v36, %v1469_v44 }
  0xee   :  { %458 = vadd.xlane.f32.xlu1 %v405_v53  ;;  %456 = vadd.xlane.f32.xlu0 %v404_v54  ;;  %v410_v23 = vmul.f32 %v1352_v36, %v1471_v45 }
  0xf2   :  { %562 = vadd.xlane.f32.xlu1 %v525_v58  ;;  %560 = vadd.xlane.f32.xlu0 %v524_v59 }
  0xf6   :  { %594 = vadd.xlane.f32.xlu1 %v541_v60  ;;  %592 = vadd.xlane.f32.xlu0 %v540_v61 }
  0xfa   :  { %430 = vadd.xlane.f32.xlu1 %v391_v2  ;;  %428 = vadd.xlane.f32.xlu0 %v390_v3 }
  0xfe   :  { %462 = vadd.xlane.f32.xlu1 %v407_v62  ;;  %460 = vadd.xlane.f32.xlu0 %v406_v4 }
 0x102   :  { %566 = vadd.xlane.f32.xlu1 %v527_v63  ;;  %564 = vadd.xlane.f32.xlu0 %v526_v5 }
 0x106   :  { %598 = vadd.xlane.f32.xlu1 %v543_v6  ;;  %596 = vadd.xlane.f32.xlu0 %v542_v7 }
 0x10a   :  { %434 = vadd.xlane.f32.xlu1 %v393_v10  ;;  %432 = vadd.xlane.f32.xlu0 %v392_v57 }
 0x10e   :  { %466 = vadd.xlane.f32.xlu1 %v409_v11  ;;  %464 = vadd.xlane.f32.xlu0 %v408_v16 }
 0x112   :  { %570 = vadd.xlane.f32.xlu1 %v529_v12  ;;  %568 = vadd.xlane.f32.xlu0 %v528_v17 }
 0x116   :  { %602 = vadd.xlane.f32.xlu1 %v545_v14  ;;  %600 = vadd.xlane.f32.xlu0 %v544_v15 }
 0x11a   :  { %438 = vadd.xlane.f32.xlu1 %v395_v19  ;;  %436 = vadd.xlane.f32.xlu0 %v394_v21 }
 0x11e   :  { %470 = vadd.xlane.f32.xlu1 %v1467_v42  ;;  %468 = vadd.xlane.f32.xlu0 %v410_v23 }
 0x122   :  { %574 = vadd.xlane.f32.xlu1 %v1475_v46  ;;  %572 = vadd.xlane.f32.xlu0 %v1492_v55 }
 0x126   :  { %606 = vadd.xlane.f32.xlu1 %v1478_v47  ;;  %604 = vadd.xlane.f32.xlu0 %v1496_v51 }
 0x12a   :  { %442 = vadd.xlane.f32.xlu1 %v1503_v0  ;;  %440 = vadd.xlane.f32.xlu0 %v1523_v56 }
 0x12e   :  { %474 = vadd.xlane.f32.xlu1 %v1506_v1  ;;  %472 = vadd.xlane.f32.xlu0 %v1526_v13 }
 0x132   :  { %578 = vadd.xlane.f32.xlu1 %v1513_v8  ;;  %576 = vadd.xlane.f32.xlu0 %v1529_v18 }
 0x136   :  { %610 = vadd.xlane.f32.xlu1 %v1516_v9  ;;  %608 = vadd.xlane.f32.xlu0 %v1532_v20 }
 0x13a   :  { %446 = vadd.xlane.f32.xlu1 %v1539_v26  ;;  %444 = vadd.xlane.f32.xlu0 %v1555_v39 }
 0x13e   :  { %478 = vadd.xlane.f32.xlu1 %v1542_v27  ;;  %476 = vadd.xlane.f32.xlu0 %v1558_v40 }
 0x142   :  { %582 = vadd.xlane.f32.xlu1 %v1545_v32  ;;  %580 = vadd.xlane.f32.xlu0 %v1561_v49 }
 0x146   :  { %614 = vadd.xlane.f32.xlu1 %v1548_v33  ;;  %612 = vadd.xlane.f32.xlu0 %v1564_v50 }
 0x147   :  { %1164 = shalt.err (!%p1161_p4)
}
 0x148   :  { %s1176_s18 = smov 64   ;;  %s1177_s19 = smov 4  }
 0x149   :  { %854 = dma.vmem_to_hbm [thread:$0]  %s849_s3, 2048, %s1904_s4, [#allocation3], %s1176_s18, %s1176_s18, %s1177_s19  }
 0x153   :  { %v451_v36 = vpop.xlane.xlu1 %450  ;;  %v419_v43 = vpop.xlane.xlu0 %418 }
 0x154   :  { %498 = vst.msk [vmem:[%s1905_s5 + $0x88] sm:$0xff] %vm480_vm2, %v451_v36  ;;  %482 = vst.msk [vmem:[%s1905_s5 + $0x8] sm:$0xff] %vm480_vm2, %v419_v43 }
 0x157   :  { %v555_v24 = vpop.xlane.xlu1 %554  ;;  %v417_v28 = vpop.xlane.xlu0 %416 }
 0x158   :  { %617 = vst.msk [vmem:[%s1906_s6 + $0x8] sm:$0xff] %vm480_vm2, %v555_v24  ;;  %481 = vst.msk [vmem:[%s1905_s5] sm:$0xff] %vm480_vm2, %v417_v28 }
 0x15b   :  { %v587_v29 = vpop.xlane.xlu1 %586  ;;  %v449_v37 = vpop.xlane.xlu0 %448 }
 0x15c   :  { %633 = vst.msk [vmem:[%s1906_s6 + $0x88] sm:$0xff] %vm480_vm2, %v587_v29  ;;  %497 = vst.msk [vmem:[%s1905_s5 + $0x80] sm:$0xff] %vm480_vm2, %v449_v37 }
 0x15f   :  { %v553_v42 = vpop.xlane.xlu0 %552  ;;  %v423_v44 = vpop.xlane.xlu1 %422 }
 0x160   :  { %616 = vst.msk [vmem:[%s1906_s6] sm:$0xff] %vm480_vm2, %v553_v42  ;;  %484 = vst.msk [vmem:[%s1905_s5 + $0x18] sm:$0xff] %vm480_vm2, %v423_v44 }
 0x163   :  { %v585_v45 = vpop.xlane.xlu0 %584  ;;  %v455_v46 = vpop.xlane.xlu1 %454 }
 0x164   :  { %632 = vst.msk [vmem:[%s1906_s6 + $0x80] sm:$0xff] %vm480_vm2, %v585_v45  ;;  %500 = vst.msk [vmem:[%s1905_s5 + $0x98] sm:$0xff] %vm480_vm2, %v455_v46 }
 0x167   :  { %v453_v47 = vpop.xlane.xlu0 %452  ;;  %v559_v55 = vpop.xlane.xlu1 %558 }
 0x168   :  { %499 = vst.msk [vmem:[%s1905_s5 + $0x90] sm:$0xff] %vm480_vm2, %v453_v47  ;;  %619 = vst.msk [vmem:[%s1906_s6 + $0x18] sm:$0xff] %vm480_vm2, %v559_v55 }
 0x16b   :  { %v591_v51 = vpop.xlane.xlu1 %590  ;;  %v557_v0 = vpop.xlane.xlu0 %556 }
 0x16c   :  { %635 = vst.msk [vmem:[%s1906_s6 + $0x98] sm:$0xff] %vm480_vm2, %v591_v51  ;;  %618 = vst.msk [vmem:[%s1906_s6 + $0x10] sm:$0xff] %vm480_vm2, %v557_v0 }
 0x16f   :  { %v589_v1 = vpop.xlane.xlu0 %588  ;;  %v421_v8 = vpop.xlane.xlu1 %420 }
 0x170   :  { %634 = vst.msk [vmem:[%s1906_s6 + $0x90] sm:$0xff] %vm480_vm2, %v589_v1  ;;  %483 = vst.msk [vmem:[%s1905_s5 + $0x10] sm:$0xff] %vm480_vm2, %v421_v8 }
 0x173   :  { %v427_v9 = vpop.xlane.xlu1 %426  ;;  %v425_v56 = vpop.xlane.xlu0 %424 }
 0x174   :  { %486 = vst.msk [vmem:[%s1905_s5 + $0x28] sm:$0xff] %vm480_vm2, %v427_v9  ;;  %485 = vst.msk [vmem:[%s1905_s5 + $0x20] sm:$0xff] %vm480_vm2, %v425_v56 }
 0x177   :  { %v459_v13 = vpop.xlane.xlu1 %458  ;;  %v457_v18 = vpop.xlane.xlu0 %456 }
 0x178   :  { %502 = vst.msk [vmem:[%s1905_s5 + $0xa8] sm:$0xff] %vm480_vm2, %v459_v13  ;;  %501 = vst.msk [vmem:[%s1905_s5 + $0xa0] sm:$0xff] %vm480_vm2, %v457_v18 }
 0x17b   :  { %v563_v20 = vpop.xlane.xlu1 %562  ;;  %v561_v22 = vpop.xlane.xlu0 %560 }
 0x17c   :  { %621 = vst.msk [vmem:[%s1906_s6 + $0x28] sm:$0xff] %vm480_vm2, %v563_v20  ;;  %620 = vst.msk [vmem:[%s1906_s6 + $0x20] sm:$0xff] %vm480_vm2, %v561_v22 }
 0x17f   :  { %v595_v25 = vpop.xlane.xlu1 %594  ;;  %v593_v26 = vpop.xlane.xlu0 %592 }
 0x180   :  { %637 = vst.msk [vmem:[%s1906_s6 + $0xa8] sm:$0xff] %vm480_vm2, %v595_v25  ;;  %636 = vst.msk [vmem:[%s1906_s6 + $0xa0] sm:$0xff] %vm480_vm2, %v593_v26 }
 0x183   :  { %v431_v27 = vpop.xlane.xlu1 %430  ;;  %v429_v30 = vpop.xlane.xlu0 %428 }
 0x184   :  { %488 = vst.msk [vmem:[%s1905_s5 + $0x38] sm:$0xff] %vm480_vm2, %v431_v27  ;;  %487 = vst.msk [vmem:[%s1905_s5 + $0x30] sm:$0xff] %vm480_vm2, %v429_v30 }
 0x187   :  { %v463_v31 = vpop.xlane.xlu1 %462  ;;  %v461_v32 = vpop.xlane.xlu0 %460 }
 0x188   :  { %504 = vst.msk [vmem:[%s1905_s5 + $0xb8] sm:$0xff] %vm480_vm2, %v463_v31  ;;  %503 = vst.msk [vmem:[%s1905_s5 + $0xb0] sm:$0xff] %vm480_vm2, %v461_v32 }
 0x18b   :  { %v567_v33 = vpop.xlane.xlu1 %566  ;;  %v565_v34 = vpop.xlane.xlu0 %564 }
 0x18c   :  { %623 = vst.msk [vmem:[%s1906_s6 + $0x38] sm:$0xff] %vm480_vm2, %v567_v33  ;;  %622 = vst.msk [vmem:[%s1906_s6 + $0x30] sm:$0xff] %vm480_vm2, %v565_v34 }
 0x18f   :  { %v599_v38 = vpop.xlane.xlu1 %598  ;;  %v597_v39 = vpop.xlane.xlu0 %596 }
 0x190   :  { %639 = vst.msk [vmem:[%s1906_s6 + $0xb8] sm:$0xff] %vm480_vm2, %v599_v38  ;;  %638 = vst.msk [vmem:[%s1906_s6 + $0xb0] sm:$0xff] %vm480_vm2, %v597_v39 }
 0x193   :  { %v435_v40 = vpop.xlane.xlu1 %434  ;;  %v433_v41 = vpop.xlane.xlu0 %432 }
 0x194   :  { %490 = vst.msk [vmem:[%s1905_s5 + $0x48] sm:$0xff] %vm480_vm2, %v435_v40  ;;  %489 = vst.msk [vmem:[%s1905_s5 + $0x40] sm:$0xff] %vm480_vm2, %v433_v41 }
 0x197   :  { %v467_v48 = vpop.xlane.xlu1 %466  ;;  %v465_v49 = vpop.xlane.xlu0 %464 }
 0x198   :  { %506 = vst.msk [vmem:[%s1905_s5 + $0xc8] sm:$0xff] %vm480_vm2, %v467_v48  ;;  %505 = vst.msk [vmem:[%s1905_s5 + $0xc0] sm:$0xff] %vm480_vm2, %v465_v49 }
 0x19b   :  { %v571_v50 = vpop.xlane.xlu1 %570  ;;  %v569_v52 = vpop.xlane.xlu0 %568 }
 0x19c   :  { %625 = vst.msk [vmem:[%s1906_s6 + $0x48] sm:$0xff] %vm480_vm2, %v571_v50  ;;  %624 = vst.msk [vmem:[%s1906_s6 + $0x40] sm:$0xff] %vm480_vm2, %v569_v52 }
 0x19f   :  { %v603_v35 = vpop.xlane.xlu1 %602  ;;  %v601_v53 = vpop.xlane.xlu0 %600 }
 0x1a0   :  { %641 = vst.msk [vmem:[%s1906_s6 + $0xc8] sm:$0xff] %vm480_vm2, %v603_v35  ;;  %640 = vst.msk [vmem:[%s1906_s6 + $0xc0] sm:$0xff] %vm480_vm2, %v601_v53 }
 0x1a3   :  { %v439_v54 = vpop.xlane.xlu1 %438  ;;  %v437_v58 = vpop.xlane.xlu0 %436 }
 0x1a4   :  { %492 = vst.msk [vmem:[%s1905_s5 + $0x58] sm:$0xff] %vm480_vm2, %v439_v54  ;;  %491 = vst.msk [vmem:[%s1905_s5 + $0x50] sm:$0xff] %vm480_vm2, %v437_v58 }
 0x1a7   :  { %v471_v59 = vpop.xlane.xlu1 %470  ;;  %v469_v60 = vpop.xlane.xlu0 %468 }
 0x1a8   :  { %508 = vst.msk [vmem:[%s1905_s5 + $0xd8] sm:$0xff] %vm480_vm2, %v471_v59  ;;  %507 = vst.msk [vmem:[%s1905_s5 + $0xd0] sm:$0xff] %vm480_vm2, %v469_v60 }
 0x1ab   :  { %v575_v61 = vpop.xlane.xlu1 %574  ;;  %v573_v2 = vpop.xlane.xlu0 %572 }
 0x1ac   :  { %627 = vst.msk [vmem:[%s1906_s6 + $0x58] sm:$0xff] %vm480_vm2, %v575_v61  ;;  %626 = vst.msk [vmem:[%s1906_s6 + $0x50] sm:$0xff] %vm480_vm2, %v573_v2 }
 0x1af   :  { %v607_v3 = vpop.xlane.xlu1 %606  ;;  %v605_v62 = vpop.xlane.xlu0 %604 }
 0x1b0   :  { %643 = vst.msk [vmem:[%s1906_s6 + $0xd8] sm:$0xff] %vm480_vm2, %v607_v3  ;;  %642 = vst.msk [vmem:[%s1906_s6 + $0xd0] sm:$0xff] %vm480_vm2, %v605_v62 }
 0x1b3   :  { %v443_v4 = vpop.xlane.xlu1 %442  ;;  %v441_v63 = vpop.xlane.xlu0 %440 }
 0x1b4   :  { %494 = vst.msk [vmem:[%s1905_s5 + $0x68] sm:$0xff] %vm480_vm2, %v443_v4  ;;  %493 = vst.msk [vmem:[%s1905_s5 + $0x60] sm:$0xff] %vm480_vm2, %v441_v63 }
 0x1b7   :  { %v475_v5 = vpop.xlane.xlu1 %474  ;;  %v473_v6 = vpop.xlane.xlu0 %472 }
 0x1b8   :  { %510 = vst.msk [vmem:[%s1905_s5 + $0xe8] sm:$0xff] %vm480_vm2, %v475_v5  ;;  %509 = vst.msk [vmem:[%s1905_s5 + $0xe0] sm:$0xff] %vm480_vm2, %v473_v6 }
 0x1bb   :  { %v579_v7 = vpop.xlane.xlu1 %578  ;;  %v577_v10 = vpop.xlane.xlu0 %576 }
 0x1bc   :  { %629 = vst.msk [vmem:[%s1906_s6 + $0x68] sm:$0xff] %vm480_vm2, %v579_v7  ;;  %628 = vst.msk [vmem:[%s1906_s6 + $0x60] sm:$0xff] %vm480_vm2, %v577_v10 }
 0x1bf   :  { %v611_v57 = vpop.xlane.xlu1 %610  ;;  %v609_v11 = vpop.xlane.xlu0 %608 }
 0x1c0   :  { %645 = vst.msk [vmem:[%s1906_s6 + $0xe8] sm:$0xff] %vm480_vm2, %v611_v57  ;;  %644 = vst.msk [vmem:[%s1906_s6 + $0xe0] sm:$0xff] %vm480_vm2, %v609_v11 }
 0x1c3   :  { %v447_v16 = vpop.xlane.xlu1 %446  ;;  %v445_v12 = vpop.xlane.xlu0 %444 }
 0x1c4   :  { %496 = vst.msk [vmem:[%s1905_s5 + $0x78] sm:$0xff] %vm480_vm2, %v447_v16  ;;  %495 = vst.msk [vmem:[%s1905_s5 + $0x70] sm:$0xff] %vm480_vm2, %v445_v12 }
 0x1c7   :  { %v479_v17 = vpop.xlane.xlu1 %478  ;;  %v477_v14 = vpop.xlane.xlu0 %476 }
 0x1c8   :  { %512 = vst.msk [vmem:[%s1905_s5 + $0xf8] sm:$0xff] %vm480_vm2, %v479_v17  ;;  %511 = vst.msk [vmem:[%s1905_s5 + $0xf0] sm:$0xff] %vm480_vm2, %v477_v14 }
 0x1cb   :  { %v583_v15 = vpop.xlane.xlu1 %582  ;;  %v581_v19 = vpop.xlane.xlu0 %580 }
 0x1cc   :  { %631 = vst.msk [vmem:[%s1906_s6 + $0x78] sm:$0xff] %vm480_vm2, %v583_v15  ;;  %630 = vst.msk [vmem:[%s1906_s6 + $0x70] sm:$0xff] %vm480_vm2, %v581_v19 }
 0x1cf   :  { %v615_v21 = vpop.xlane.xlu1 %614  ;;  %v613_v23 = vpop.xlane.xlu0 %612 }
 0x1d0   :  { %647 = vst.msk [vmem:[%s1906_s6 + $0xf8] sm:$0xff] %vm480_vm2, %v615_v21  ;;  %646 = vst.msk [vmem:[%s1906_s6 + $0xf0] sm:$0xff] %vm480_vm2, %v613_v23 }
 0x1d1   :  { %1173 = dma.done.wait [#allocation3], 2048  }
 0x1d2   :  { %1174 = vsyncadd [#allocation3], 4294965248 }
 0x1d3   :  { %866 = vsyncpa [#allocation3], 1 }

</bundles_post_ra>
